<compile_context>
chip_gen: v7x
topology: tpu7x:2x2x1
jax: 0.10.0
libtpu: 0.0.40
codegen_flags: <defaults>
</compile_context>

<pallas_src>
import jax
import jax.numpy as jnp
from jax.experimental import pallas as pl
from jax.experimental.pallas import tpu as pltpu

IN_FEATURES = 10
HIDDEN = 5
OUT_FEATURES = 1

_DEFAULT_BATCH_TILE = 512  # rows per grid step (sweet spot ~512-2048, mem-bound)


def _round_up(n, m):
    return ((n + m - 1) // m) * m


def _mlp_kernel(x_ref, w1_ref, b1_ref, w2_ref, b2_ref, o_ref):
    # x_ref:  [TB, 10]   w1_ref: [10, 5]   b1_ref: [1, 5]
    # w2_ref: [5, 1]     b2_ref: [1, 1]    o_ref:  [TB, 1]
    x = x_ref[...]
    h = jnp.dot(x, w1_ref[...], preferred_element_type=jnp.float32) + b1_ref[...]
    h = jnp.maximum(h, 0.0)  # ReLU
    y = jnp.dot(h, w2_ref[...], preferred_element_type=jnp.float32) + b2_ref[...]
    o_ref[...] = y.astype(o_ref.dtype)


def mock_torch_model(x, w1, b1, w2, b2, *, batch_tile=_DEFAULT_BATCH_TILE):
    """Forward pass of MockTorchModel.

    x:  [B, 10] float32
    w1: [10, 5] float32 (transposed vs PyTorch's (5, 10))
    b1: [5]     float32
    w2: [5, 1]  float32 (transposed vs PyTorch's (1, 5))
    b2: [1]     float32
    returns: [B, 1] float32
    """
    B = x.shape[0]

    # Batch tile: multiple of 8 (sublane), capped at batch_tile, never bigger
    # than the (sublane-rounded) batch itself.
    TB = min(batch_tile, _round_up(B, 8))
    B_pad = _round_up(B, TB)
    if B_pad != B:
        x = jnp.pad(x, ((0, B_pad - B), (0, 0)))

    b1_2d = b1.reshape(1, HIDDEN)
    b2_2d = b2.reshape(1, OUT_FEATURES)

    out = pl.pallas_call(
        _mlp_kernel,
        out_shape=jax.ShapeDtypeStruct((B_pad, OUT_FEATURES), jnp.float32),
        grid=(B_pad // TB,),
        in_specs=[
            pl.BlockSpec((TB, IN_FEATURES), lambda i: (i, 0)),          # x tile
            pl.BlockSpec((IN_FEATURES, HIDDEN), lambda i: (0, 0)),      # w1 (resident)
            pl.BlockSpec((1, HIDDEN), lambda i: (0, 0)),                # b1 (resident)
            pl.BlockSpec((HIDDEN, OUT_FEATURES), lambda i: (0, 0)),     # w2 (resident)
            pl.BlockSpec((1, OUT_FEATURES), lambda i: (0, 0)),          # b2 (resident)
        ],
        out_specs=pl.BlockSpec((TB, OUT_FEATURES), lambda i: (i, 0)),
        compiler_params=pltpu.CompilerParams(
            dimension_semantics=("parallel",),
        ),
    )(x, w1, b1_2d, w2, b2_2d)

    return out[:B]


def _reference(x, w1, b1, w2, b2):
    h = jnp.maximum(x @ w1 + b1, 0.0)
    return h @ w2 + b2


if __name__ == "__main__":
    key = jax.random.PRNGKey(0)
    kx, k1, k2, k3, k4 = jax.random.split(key, 5)

    # Deterministic parameter init (mimics PyTorch Linear's
    # uniform(-1/sqrt(fan_in), 1/sqrt(fan_in))).
    bound1 = 1.0 / (IN_FEATURES ** 0.5)
    w1 = jax.random.uniform(k1, (IN_FEATURES, HIDDEN),
                            minval=-bound1, maxval=bound1, dtype=jnp.float32)
    b1 = jax.random.uniform(k2, (HIDDEN,),
                            minval=-bound1, maxval=bound1, dtype=jnp.float32)
    bound2 = 1.0 / (HIDDEN ** 0.5)
    w2 = jax.random.uniform(k3, (HIDDEN, OUT_FEATURES),
                            minval=-bound2, maxval=bound2, dtype=jnp.float32)
    b2 = jax.random.uniform(k4, (OUT_FEATURES,),
                            minval=-bound2, maxval=bound2, dtype=jnp.float32)

    ok = True

    # Small batch (exact tile).
    B = 8
    x = jax.random.normal(kx, (B, IN_FEATURES), dtype=jnp.float32)
    out = jax.block_until_ready(mock_torch_model(x, w1, b1, w2, b2))
    ref = _reference(x, w1, b1, w2, b2)
    ok &= out.shape == (B, OUT_FEATURES)
    ok &= bool(jnp.allclose(out, ref, atol=1e-5, rtol=1e-5))

    # Ragged batch (exercises wrapper-side padding + slice-off path).
    B2 = 13
    x2 = jax.random.normal(jax.random.PRNGKey(1), (B2, IN_FEATURES), dtype=jnp.float32)
    out2 = jax.block_until_ready(mock_torch_model(x2, w1, b1, w2, b2))
    ref2 = _reference(x2, w1, b1, w2, b2)
    ok &= out2.shape == (B2, OUT_FEATURES)
    ok &= bool(jnp.allclose(out2, ref2, atol=1e-5, rtol=1e-5))

    assert ok, "mismatch vs reference"
    print("KERNEL_OK")
</pallas_src>

<mosaic_0001>
module attributes {stable_mosaic.version = 11 : i64} {
  func.func @_mlp_kernel(%arg0: i32, %arg1: memref<8x10xf32, #tpu.memory_space<vmem>>, %arg2: memref<10x5xf32, #tpu.memory_space<vmem>>, %arg3: memref<1x5xf32, #tpu.memory_space<vmem>>, %arg4: memref<5x1xf32, #tpu.memory_space<vmem>>, %arg5: memref<1x1xf32, #tpu.memory_space<vmem>>, %arg6: memref<8x1xf32, #tpu.memory_space<vmem>>) attributes {dimension_semantics = [#tpu.dimension_semantics<parallel>], iteration_bounds = array<i64: 1>, scalar_prefetch = 0 : i64, scratch_operands = 0 : i64, tpu.core_type = #tpu.core_type<tc>, window_params = [{transform_indices = @transform_0, window_bounds = array<i64: 8, 10>}, {pipeline_mode = #tpu.pipeline_mode<synchronous>, transform_indices = @transform_1, window_bounds = array<i64: 10, 5>}, {pipeline_mode = #tpu.pipeline_mode<synchronous>, transform_indices = @transform_2, window_bounds = array<i64: 1, 5>}, {pipeline_mode = #tpu.pipeline_mode<synchronous>, transform_indices = @transform_3, window_bounds = array<i64: 5, 1>}, {pipeline_mode = #tpu.pipeline_mode<synchronous>, transform_indices = @transform_4, window_bounds = array<i64: 1, 1>}, {transform_indices = @transform_5, window_bounds = array<i64: 8, 1>}]} {
    %c0 = arith.constant 0 : index
    %c0_0 = arith.constant 0 : index
    %0 = vector.load %arg1[%c0, %c0_0] : memref<8x10xf32, #tpu.memory_space<vmem>>, vector<8x10xf32>
    %c0_1 = arith.constant 0 : index
    %c0_2 = arith.constant 0 : index
    %1 = vector.load %arg2[%c0_1, %c0_2] : memref<10x5xf32, #tpu.memory_space<vmem>>, vector<10x5xf32>
    %cst = arith.constant dense<0.000000e+00> : vector<8x5xf32>
    %2 = tpu.matmul %0, %1, %cst {dimension_numbers = #tpu.dot_dimension_numbers<[1], [0], [0], [1], [0, 0, 1, 1], [], []>} : vector<8x10xf32>, vector<10x5xf32>, vector<8x5xf32> -> vector<8x5xf32>
    %c0_3 = arith.constant 0 : index
    %c0_4 = arith.constant 0 : index
    %3 = vector.load %arg3[%c0_3, %c0_4] : memref<1x5xf32, #tpu.memory_space<vmem>>, vector<1x5xf32>
    %4 = vector.broadcast %3 : vector<1x5xf32> to vector<8x5xf32>
    %5 = arith.addf %2, %4 : vector<8x5xf32>
    %cst_5 = arith.constant 0.000000e+00 : f32
    %6 = vector.broadcast %cst_5 : f32 to vector<8x5xf32>
    %7 = arith.maximumf %5, %6 : vector<8x5xf32>
    %c0_6 = arith.constant 0 : index
    %c0_7 = arith.constant 0 : index
    %8 = vector.load %arg4[%c0_6, %c0_7] : memref<5x1xf32, #tpu.memory_space<vmem>>, vector<5x1xf32>
    %cst_8 = arith.constant dense<0.000000e+00> : vector<8x1xf32>
    %9 = tpu.matmul %7, %8, %cst_8 {dimension_numbers = #tpu.dot_dimension_numbers<[1], [0], [0], [1], [0, 0, 1, 1], [], []>} : vector<8x5xf32>, vector<5x1xf32>, vector<8x1xf32> -> vector<8x1xf32>
    %c0_9 = arith.constant 0 : index
    %c0_10 = arith.constant 0 : index
    %10 = vector.load %arg5[%c0_9, %c0_10] : memref<1x1xf32, #tpu.memory_space<vmem>>, vector<1x1xf32>
    %11 = vector.broadcast %10 : vector<1x1xf32> to vector<8x1xf32>
    %12 = arith.addf %9, %11 : vector<8x1xf32>
    %c0_11 = arith.constant 0 : index
    %c0_12 = arith.constant 0 : index
    %13 = vector.load %arg6[%c0_11, %c0_12] : memref<8x1xf32, #tpu.memory_space<vmem>>, vector<8x1xf32>
    tpu.vector_store %arg6[%c0_11, %c0_12], %12 {strides = array<i32>} : memref<8x1xf32, #tpu.memory_space<vmem>>, vector<8x1xf32>,
    return
  }
  func.func @transform_0(%arg0: i32) -> (i32, i32) {
    %c0_i32 = arith.constant 0 : i32
    %c0_i32_0 = arith.constant 0 : i32
    return %arg0, %c0_i32 : i32, i32
  }
  func.func @transform_1(%arg0: i32) -> (i32, i32) {
    %c0_i32 = arith.constant 0 : i32
    %c0_i32_0 = arith.constant 0 : i32
    %c0_i32_1 = arith.constant 0 : i32
    return %c0_i32, %c0_i32_0 : i32, i32
  }
  func.func @transform_2(%arg0: i32) -> (i32, i32) {
    %c0_i32 = arith.constant 0 : i32
    %c0_i32_0 = arith.constant 0 : i32
    %c0_i32_1 = arith.constant 0 : i32
    return %c0_i32, %c0_i32_0 : i32, i32
  }
  func.func @transform_3(%arg0: i32) -> (i32, i32) {
    %c0_i32 = arith.constant 0 : i32
    %c0_i32_0 = arith.constant 0 : i32
    %c0_i32_1 = arith.constant 0 : i32
    return %c0_i32, %c0_i32_0 : i32, i32
  }
  func.func @transform_4(%arg0: i32) -> (i32, i32) {
    %c0_i32 = arith.constant 0 : i32
    %c0_i32_0 = arith.constant 0 : i32
    %c0_i32_1 = arith.constant 0 : i32
    return %c0_i32, %c0_i32_0 : i32, i32
  }
  func.func @transform_5(%arg0: i32) -> (i32, i32) {
    %c0_i32 = arith.constant 0 : i32
    %c0_i32_0 = arith.constant 0 : i32
    return %arg0, %c0_i32 : i32, i32
  }
}

</mosaic_0001>

<bundles_post_ra>
// kernel: tpu_custom_call.1
= control target key start
LH: loop header
LB: loop body
LE: loop exit
PB: predicated region body
PF: predicated region fallthrough
CT: control target
= control target key end

     0   :  { %vm36_vm0 = vcmask 1041408   ;;  %v234_v0 = vmov 0.0|0.0   ;;  %vm235_vm1 = vmmov 1   ;;  %vm236_vm3 = vmmov 0   ;;  %s289_s1 = inlined_call_operand.vmem [shape: f32[10,5], index: 1, kind: input, shape index: {}]   ;;  %s290_s0 = inlined_call_operand.vmem [shape: f32[8,10], index: 0, kind: input, shape index: {}]   ;;  %s291_s3 = inlined_call_operand.vmem [shape: f32[5,1], index: 3, kind: input, shape index: {}]   ;;  %s292_s4 = inlined_call_operand.<no memory space> [shape: f32[1,1], index: 4, kind: input, shape index: {}]   ;;  %s293_s2 = inlined_call_operand.vmem [shape: f32[1,5], index: 2, kind: input, shape index: {}]   ;;  %s294_s5 = inlined_call_operand.vmem [shape: f32[8,1], index: 5, kind: output, shape index: {}]  }
   0x1   :  { %226 = vmatprep.subr.bf16.mxu0 %v234_v0  ;;  %v23_v1 = vld [vmem:[%s289_s1] sm:$0xff]  ;;  %v24_v2 = vld [vmem:[%s289_s1 + $0x8] sm:$0x3]  ;;  %vm228_vm2 = vmpackc.low %vm36_vm0, %vm235_vm1  ;;  %v237_v4 = vmov 0.0   ;;  %vm32_vm4 = vcmask 80896   ;;  %vm123_vm5 = vcmask 1044480   ;;  %v10_v7 = vstv %s292_s4 }
   0x2   :  { %v227_v3 = vpack.c.bf16 %v24_v2, %v23_v1  ;;  %218 = vmatprep.mubr.msk.f32.mxu0 %vm236_vm3, %v237_v4  ;;  %221 = vmatprep.subr.mxu1 %v237_v4  ;;  %v22_v5 = vld [vmem:[%s290_s0] sm:$0xff]  ;;  %11 = vst [vmem:[#allocation2] sm:$0x1] %v10_v7  ;;  %vm119_vm6 = vcmask 39936   ;;  %vm197_vm7 = vcmask 7168  }
   0x3   :  { %223 = vmatprep.mubr.msk.f32.mxu1 %vm236_vm3, %v237_v4  ;;  %v111_v6 = vld [vmem:[%s291_s3] sm:$0x1f] }
   0x4   :  { %229 = vmatpush3.bf16.msk.msra.mxu0 %vm228_vm2, %v227_v3  ;;  %222 = vmatpush3.msk.msra.mxu1 %vm123_vm5, %v111_v6  ;;  %v203_v8 = vld [vmem:[%s293_s2] ss:$0 sm:$0xff] }
   0x7   :  { %219 = vmatmul.mubr.msk.f32.vlgmr.msra.gmra.mrb[0].mxu0 %vm32_vm4, %v22_v5 }
   0x9   :  { %v206_v13 = vld [vmem:[#allocation2] ss:$0 sm:$0xff] }
  0xda   :  { %v106_v9 = vpop.f32.mrb[0].mxu0 }
  0xdb   :  { %v107_v10 = vadd.f32 %v203_v8, %v106_v9  ;;  %v220_v11 = vpop.f32.mrb[1].mxu0 }
  0xdd   :  { %v110_v12 = vmax.f32 %v107_v10, 0.0 }
  0xdf   :  { %224 = vmatmul.mubr.msk.f32.vlgmr.msra.gmra.mrb[0].mxu1 %vm119_vm6, %v110_v12 }
 0x1b2   :  { %v193_v14 = vpop.f32.mrb[0].mxu1 }
 0x1b3   :  { %v194_v15 = vadd.f32 %v206_v13, %v193_v14  ;;  %v225_v16 = vpop.f32.mrb[1].mxu1 }
 0x1b5   :  { %198 = vst.msk [vmem:[%s294_s5] sm:$0xff] %vm197_vm7, %v194_v15 }

</bundles_post_ra>
